<compile_context>
chip_gen: v5e
topology: v5e:2x2
jax: 0.10.0
libtpu: 0.0.40
codegen_flags: <defaults>
</compile_context>

<pallas_src>
import math

import jax
import jax.numpy as jnp
from jax.experimental import pallas as pl
from jax.experimental.pallas import tpu as pltpu


# ----------------------------------------------------------------------------
# Fused kernel: all ResBlocks, group-of-images activation resident in VMEM.
# ----------------------------------------------------------------------------
def _fused_resgroup_kernel(x_ref, w1_ref, b1_ref, w2_ref, b2_ref, o_ref,
                           act_ref, tmp_ref):
    # x_ref  : (GB, H, WC) f32            group of input images (rows = W*Cp lanes)
    # w1_ref : (n_blocks, 3*WC, WC) bf16  banded conv1 weights, ALL blocks (resident)
    # b1_ref : (n_blocks, 1, WC)  f32     conv1 bias (tiled over W)
    # w2_ref, b2_ref : same for conv2
    # o_ref  : (GB, H, WC) f32            output images
    # act_ref: (Mtot, WC) f32  resident slab: [8 zero rows] + GB*[H interior +
    #                          (stride-H) zero rows] + [8 zero rows]
    # tmp_ref: (Mtot, WC) f32  slab for y = relu(conv1(x) + b1), same layout
    k = pl.program_id(1)
    GB, H, WC = x_ref.shape
    Mtot = act_ref.shape[0]
    Mout = Mtot - 16                 # compute region = slab rows [8, 8 + Mout)
    stride = Mout // GB              # per-image row stride (multiple of 8)

    @pl.when(k == 0)
    def _init():
        # Zero only the halo / separator rows; interiors are overwritten below.
        zpad = jnp.zeros((8, WC), jnp.float32)
        act_ref[0:8, :] = zpad
        tmp_ref[0:8, :] = zpad
        act_ref[Mtot - 8:Mtot, :] = zpad
        tmp_ref[Mtot - 8:Mtot, :] = zpad
        for j in range(GB):
            base = 8 + j * stride
            act_ref[base:base + H, :] = x_ref[j].astype(jnp.float32)
            act_ref[base + H:base + stride, :] = jnp.zeros(
                (stride - H, WC), jnp.float32)
        # tmp's interior region is fully (mask-)overwritten by conv1 before
        # conv2 reads it, so only its outer pad rows need zeroing.

    # Row mask over the compute region: 1 on image-interior rows, 0 on the zero
    # separator rows.  Keeps the slabs' halo rows exactly zero so they serve as
    # the convs' vertical SAME padding for this block and the next one.
    row = jax.lax.broadcasted_iota(jnp.int32, (Mout, 1), 0)
    interior = row < H
    for j in range(1, GB):
        interior = interior | ((row >= j * stride) & (row < j * stride + H))
    mask = interior.astype(jnp.float32)

    # Current block's weights (all blocks live in VMEM; dynamic leading index).
    w1 = w1_ref[k]                   # (3*WC, WC) bf16
    w2 = w2_ref[k]
    b1 = b1_ref[k]                   # (1, WC) f32
    b2 = b2_ref[k]

    def conv3x3(src_ref, w_all, bias):
        # One MXU matmul per vertical tap over the whole group slab; the banded
        # weight encodes the 3 horizontal taps + horizontal SAME padding.
        # TODO(synk): on v6e/v7x, stack the 3 taps along K into a single
        # (Mout, 3*WC) x (3*WC, WC) matmul to raise MXU occupancy further.
        acc = jnp.broadcast_to(bias, (Mout, WC))
        for kh in range(3):
            lhs = src_ref[7 + kh:7 + kh + Mout, :].astype(jnp.bfloat16)
            acc = acc + jnp.dot(lhs, w_all[kh * WC:(kh + 1) * WC, :],
                                preferred_element_type=jnp.float32)
        return acc

    # conv1 + bias + ReLU  (masked so separator/halo rows stay exactly zero)
    y = jnp.maximum(conv3x3(act_ref, w1, b1), 0.0) * mask
    tmp_ref[8:8 + Mout, :] = y

    # conv2 + bias + residual add; act slab stays resident for block k+1.
    z = conv3x3(tmp_ref, w2, b2) * mask
    act_ref[8:8 + Mout, :] = act_ref[8:8 + Mout, :] + z

    @pl.when(k == pl.num_programs(1) - 1)
    def _finish():
        for j in range(GB):
            base = 8 + j * stride
            o_ref[j] = act_ref[base:base + H, :].astype(o_ref.dtype)


def _fused_resgroup_call(x3, w1b, b1f, w2b, b2f, gb):
    # x3: (num_groups*gb, H, WC); w*b: (n_blocks, 3*WC, WC) bf16;
    # b*f: (n_blocks, 1, WC) f32
    ntot, H, WC = x3.shape
    n_blocks = w1b.shape[0]
    num_groups = ntot // gb
    stride = ((H + 7) // 8) * 8 + 8        # sublane-aligned per-image stride
    mtot = gb * stride + 16                # 8 top pad + region + 8 bottom pad

    img_spec = pl.BlockSpec((gb, H, WC), lambda g, k: (g, 0, 0))
    # Constant index_map -> weights/biases DMA'd from HBM once and kept in VMEM.
    w_spec = pl.BlockSpec((n_blocks, 3 * WC, WC), lambda g, k: (0, 0, 0))
    b_spec = pl.BlockSpec((n_blocks, 1, WC), lambda g, k: (0, 0, 0))

    return pl.pallas_call(
        _fused_resgroup_kernel,
        out_shape=jax.ShapeDtypeStruct((ntot, H, WC), x3.dtype),
        grid=(num_groups, n_blocks),
        in_specs=[img_spec, w_spec, b_spec, w_spec, b_spec],
        out_specs=img_spec,                # constant over k -> resident output
        scratch_shapes=[pltpu.VMEM((mtot, WC), jnp.float32),
                        pltpu.VMEM((mtot, WC), jnp.float32)],
        compiler_params=pltpu.CompilerParams(
            dimension_semantics=("parallel", "arbitrary"),
            vmem_limit_bytes=48 * 1024 * 1024),   # < v7x 64 MiB physical VMEM
    )(x3, w1b, b1f, w2b, b2f)


# ----------------------------------------------------------------------------
# Parameter packing (host-side, once): lane-padded banded bf16 weights + biases.
# ----------------------------------------------------------------------------
def _lane_pad_channels(C, W):
    """Smallest Cp >= C such that (W * Cp) % 128 == 0 (lane-dense layout)."""
    need = 128 // math.gcd(W, 128)
    return ((C + need - 1) // need) * need


def _banded_weights(w, W, Cp):
    """[3,3,C,C] kernel -> (3*W*Cp, W*Cp) bf16 banded matrices (stacked per kh).

    For vertical tap kh, out_row_flat = in_row_flat @ band[kh], rows flattened
    as (w*Cp + c); the band encodes the 3 horizontal taps and the horizontal
    SAME-padding zeros.  Channels are zero-padded C -> Cp (padded in/out lanes
    are exactly zero so they stay zero through the residual chain).
    """
    C = w.shape[2]
    wp = jnp.zeros((3, 3, Cp, Cp), jnp.float32).at[:, :, :C, :C].set(w)
    WC = W * Cp
    p = jnp.arange(WC)                    # input-row flat index
    q = jnp.arange(WC)                    # output-row flat index
    wi, ci = p // Cp, p % Cp
    wo, co = q // Cp, q % Cp
    kw = wi[:, None] - wo[None, :] + 1    # (WC, WC)
    valid = (kw >= 0) & (kw <= 2)
    kw_c = jnp.clip(kw, 0, 2)
    vals = wp[:, kw_c, ci[:, None], co[None, :]]          # (3, WC, WC)
    band = jnp.where(valid[None, :, :], vals, 0.0)
    return band.reshape(3 * WC, WC).astype(jnp.bfloat16)


def _tiled_bias(b, W, Cp):
    bp = jnp.zeros((Cp,), jnp.float32).at[:b.shape[0]].set(b)
    return jnp.tile(bp, W)[None, :]       # (1, W*Cp) f32


def pack_params(params, W, Cp):
    """params: list of (w1 [3,3,C,C], b1 [C], w2 [3,3,C,C], b2 [C])."""
    w1b = jnp.stack([_banded_weights(w1, W, Cp) for (w1, _, _, _) in params])
    b1f = jnp.stack([_tiled_bias(b1, W, Cp) for (_, b1, _, _) in params])
    w2b = jnp.stack([_banded_weights(w2, W, Cp) for (_, _, w2, _) in params])
    b2f = jnp.stack([_tiled_bias(b2, W, Cp) for (_, _, _, b2) in params])
    return w1b, b1f, w2b, b2f


# ----------------------------------------------------------------------------
# Public entry point (NCHW in / NCHW out, matching the PyTorch module).
# ----------------------------------------------------------------------------
# Images folded into one matmul-M slab per grid step.  NOTE(v7x): with small
# batches, a smaller group (so the "parallel" group axis has >= 2 entries)
# lets the two TensorCores both work; weights are VMEM-resident either way.
_MAX_GROUP_BATCH = 8


@jax.jit
def res_group_in(x_nchw, w1b, b1f, w2b, b2f):
    N, C, H, W = x_nchw.shape
    WC = w1b.shape[-1]
    Cp = WC // W
    gb = max(1, min(_MAX_GROUP_BATCH, N))
    n_pad = (-N) % gb

    # NCHW -> NHWC, zero-pad channels to Cp, flatten rows to W*Cp lanes.
    x = jnp.transpose(x_nchw, (0, 2, 3, 1))                       # (N,H,W,C)
    x = jnp.pad(x, ((0, n_pad), (0, 0), (0, 0), (0, Cp - C)))
    x3 = x.reshape(N + n_pad, H, WC)

    out3 = _fused_resgroup_call(x3, w1b, b1f, w2b, b2f, gb)

    out = out3.reshape(N + n_pad, H, W, Cp)[:N, :, :, :C]
    return jnp.transpose(out, (0, 3, 1, 2))


# ----------------------------------------------------------------------------
# Synthetic parameters + pure-JAX reference.
# ----------------------------------------------------------------------------
def init_params(key, n_blocks, channels):
    """Deterministic synthetic parameters, shapes matching nn.Conv2d(C, C, 3)."""
    params = []
    scale = 1.0 / jnp.sqrt(9.0 * channels)
    for _ in range(n_blocks):
        k1, k2, k3, k4, key = jax.random.split(key, 5)
        w1 = jax.random.uniform(k1, (3, 3, channels, channels),
                                jnp.float32, -scale, scale)
        b1 = jax.random.uniform(k2, (channels,), jnp.float32, -scale, scale)
        w2 = jax.random.uniform(k3, (3, 3, channels, channels),
                                jnp.float32, -scale, scale)
        b2 = jax.random.uniform(k4, (channels,), jnp.float32, -scale, scale)
        params.append((w1, b1, w2, b2))
    return params


def _reference(x_nchw, params):
    """Pure-JAX f32 reference (lax conv) for a sanity check."""
    out = x_nchw
    dn = jax.lax.conv_dimension_numbers(out.shape, (1, 1, 3, 3),
                                        ("NCHW", "OIHW", "NCHW"))
    for (w1, b1, w2, b2) in params:
        w1_oihw = jnp.transpose(w1, (3, 2, 0, 1))
        w2_oihw = jnp.transpose(w2, (3, 2, 0, 1))
        y = jax.lax.conv_general_dilated(out, w1_oihw, (1, 1), "SAME",
                                         dimension_numbers=dn)
        y = jax.nn.relu(y + b1.reshape(1, -1, 1, 1))
        z = jax.lax.conv_general_dilated(y, w2_oihw, (1, 1), "SAME",
                                         dimension_numbers=dn)
        out = out + z + b2.reshape(1, -1, 1, 1)
    return out


if __name__ == "__main__":
    key = jax.random.PRNGKey(0)
    kx, kp = jax.random.split(key)

    N, C, H, W = 2, 4, 16, 16          # batch=2, channels=4, spatial=16
    n_blocks = 2

    x = jax.random.normal(kx, (N, C, H, W), jnp.float32)
    params = init_params(kp, n_blocks, C)
    Cp = _lane_pad_channels(C, W)      # 4 -> 8 so W*Cp = 128 lanes
    w1b, b1f, w2b, b2f = pack_params(params, W, Cp)

    out = jax.block_until_ready(res_group_in(x, w1b, b1f, w2b, b2f))
    ref = _reference(x, params)

    assert out.shape == x.shape and out.dtype == x.dtype
    # Kernel uses bf16 MXU operands (f32 accumulation / residual), reference is
    # pure f32, so the tolerance reflects bf16 operand rounding.
    err = float(jnp.max(jnp.abs(out - ref)))
    assert jnp.allclose(out, ref, rtol=5e-2, atol=5e-2), err
    print("KERNEL_OK")
</pallas_src>

<mosaic_0001>
module attributes {stable_mosaic.version = 11 : i64} {
  func.func @_fused_resgroup_kernel(%arg0: i32, %arg1: i32, %arg2: memref<2x16x128xf32, #tpu.memory_space<vmem>>, %arg3: memref<2x384x128xbf16, #tpu.memory_space<vmem>>, %arg4: memref<2x1x128xf32, #tpu.memory_space<vmem>>, %arg5: memref<2x384x128xbf16, #tpu.memory_space<vmem>>, %arg6: memref<2x1x128xf32, #tpu.memory_space<vmem>>, %arg7: memref<2x16x128xf32, #tpu.memory_space<vmem>>, %arg8: memref<64x128xf32, #tpu.memory_space<vmem>>, %arg9: memref<64x128xf32, #tpu.memory_space<vmem>>) attributes {dimension_semantics = [#tpu.dimension_semantics<parallel>, #tpu.dimension_semantics<arbitrary>], iteration_bounds = array<i64: 1, 2>, scalar_prefetch = 0 : i64, scratch_operands = 2 : i64, tpu.core_type = #tpu.core_type<tc>, window_params = [{transform_indices = @transform_0, window_bounds = array<i64: 2, 16, 128>}, {pipeline_mode = #tpu.pipeline_mode<synchronous>, transform_indices = @transform_1, window_bounds = array<i64: 2, 384, 128>}, {pipeline_mode = #tpu.pipeline_mode<synchronous>, transform_indices = @transform_2, window_bounds = array<i64: 2, 1, 128>}, {pipeline_mode = #tpu.pipeline_mode<synchronous>, transform_indices = @transform_3, window_bounds = array<i64: 2, 384, 128>}, {pipeline_mode = #tpu.pipeline_mode<synchronous>, transform_indices = @transform_4, window_bounds = array<i64: 2, 1, 128>}, {transform_indices = @transform_5, window_bounds = array<i64: 2, 16, 128>}]} {
    %c0_i32 = arith.constant 0 : i32
    %0 = arith.cmpi eq, %arg1, %c0_i32 : i32
    %1 = arith.extui %0 : i1 to i32
    %c0_i32_0 = arith.constant 0 : i32
    %2 = arith.cmpi ne, %1, %c0_i32_0 : i32
    scf.if %2 {
      %cst_30 = arith.constant 0.000000e+00 : f32
      %73 = vector.broadcast %cst_30 : f32 to vector<8x128xf32>
      %c0_31 = arith.constant 0 : index
      %c0_32 = arith.constant 0 : index
      %74 = vector.load %arg8[%c0_31, %c0_32] : memref<64x128xf32, #tpu.memory_space<vmem>>, vector<8x128xf32>
      tpu.vector_store %arg8[%c0_31, %c0_32], %73 {strides = array<i32>} : memref<64x128xf32, #tpu.memory_space<vmem>>, vector<8x128xf32>,
      %c0_33 = arith.constant 0 : index
      %c0_34 = arith.constant 0 : index
      %75 = vector.load %arg9[%c0_33, %c0_34] : memref<64x128xf32, #tpu.memory_space<vmem>>, vector<8x128xf32>
      tpu.vector_store %arg9[%c0_33, %c0_34], %73 {strides = array<i32>} : memref<64x128xf32, #tpu.memory_space<vmem>>, vector<8x128xf32>,
      %c56 = arith.constant 56 : index
      %c0_35 = arith.constant 0 : index
      %76 = vector.load %arg8[%c56, %c0_35] : memref<64x128xf32, #tpu.memory_space<vmem>>, vector<8x128xf32>
      tpu.vector_store %arg8[%c56, %c0_35], %73 {strides = array<i32>} : memref<64x128xf32, #tpu.memory_space<vmem>>, vector<8x128xf32>,
      %c56_36 = arith.constant 56 : index
      %c0_37 = arith.constant 0 : index
      %77 = vector.load %arg9[%c56_36, %c0_37] : memref<64x128xf32, #tpu.memory_space<vmem>>, vector<8x128xf32>
      tpu.vector_store %arg9[%c56_36, %c0_37], %73 {strides = array<i32>} : memref<64x128xf32, #tpu.memory_space<vmem>>, vector<8x128xf32>,
      %c0_38 = arith.constant 0 : index
      %c0_39 = arith.constant 0 : index
      %c0_40 = arith.constant 0 : index
      %78 = vector.load %arg2[%c0_38, %c0_39, %c0_40] : memref<2x16x128xf32, #tpu.memory_space<vmem>>, vector<1x16x128xf32>
      %79 = vector.shape_cast %78 : vector<1x16x128xf32> to vector<16x128xf32>
      %c8_41 = arith.constant 8 : index
      %c0_42 = arith.constant 0 : index
      %80 = vector.load %arg8[%c8_41, %c0_42] : memref<64x128xf32, #tpu.memory_space<vmem>>, vector<16x128xf32>
      tpu.vector_store %arg8[%c8_41, %c0_42], %79 {strides = array<i32>} : memref<64x128xf32, #tpu.memory_space<vmem>>, vector<16x128xf32>,
      %cst_43 = arith.constant 0.000000e+00 : f32
      %81 = vector.broadcast %cst_43 : f32 to vector<8x128xf32>
      %c24 = arith.constant 24 : index
      %c0_44 = arith.constant 0 : index
      %82 = vector.load %arg8[%c24, %c0_44] : memref<64x128xf32, #tpu.memory_space<vmem>>, vector<8x128xf32>
      tpu.vector_store %arg8[%c24, %c0_44], %81 {strides = array<i32>} : memref<64x128xf32, #tpu.memory_space<vmem>>, vector<8x128xf32>,
      %c1 = arith.constant 1 : index
      %c0_45 = arith.constant 0 : index
      %c0_46 = arith.constant 0 : index
      %83 = vector.load %arg2[%c1, %c0_45, %c0_46] : memref<2x16x128xf32, #tpu.memory_space<vmem>>, vector<1x16x128xf32>
      %84 = vector.shape_cast %83 : vector<1x16x128xf32> to vector<16x128xf32>
      %c32 = arith.constant 32 : index
      %c0_47 = arith.constant 0 : index
      %85 = vector.load %arg8[%c32, %c0_47] : memref<64x128xf32, #tpu.memory_space<vmem>>, vector<16x128xf32>
      tpu.vector_store %arg8[%c32, %c0_47], %84 {strides = array<i32>} : memref<64x128xf32, #tpu.memory_space<vmem>>, vector<16x128xf32>,
      %cst_48 = arith.constant 0.000000e+00 : f32
      %86 = vector.broadcast %cst_48 : f32 to vector<8x128xf32>
      %c48 = arith.constant 48 : index
      %c0_49 = arith.constant 0 : index
      %87 = vector.load %arg8[%c48, %c0_49] : memref<64x128xf32, #tpu.memory_space<vmem>>, vector<8x128xf32>
      tpu.vector_store %arg8[%c48, %c0_49], %86 {strides = array<i32>} : memref<64x128xf32, #tpu.memory_space<vmem>>, vector<8x128xf32>,
    } else {
    }
    %3 = tpu.iota {dimensions = array<i32: 0>} : vector<48x1xi32>
    %c16_i32 = arith.constant 16 : i32
    %4 = vector.broadcast %c16_i32 : i32 to vector<48x1xi32>
    %5 = arith.cmpi slt, %3, %4 : vector<48x1xi32>
    %c24_i32 = arith.constant 24 : i32
    %6 = vector.broadcast %c24_i32 : i32 to vector<48x1xi32>
    %7 = arith.cmpi sge, %3, %6 : vector<48x1xi32>
    %c40_i32 = arith.constant 40 : i32
    %8 = vector.broadcast %c40_i32 : i32 to vector<48x1xi32>
    %9 = arith.cmpi slt, %3, %8 : vector<48x1xi32>
    %10 = arith.andi %7, %9 : vector<48x1xi1>
    %11 = arith.ori %5, %10 : vector<48x1xi1>
    %12 = arith.extui %11 : vector<48x1xi1> to vector<48x1xi32>
    %13 = arith.sitofp %12 : vector<48x1xi32> to vector<48x1xf32>
    %14 = arith.index_cast %arg1 : i32 to index
    %c0 = arith.constant 0 : index
    %c0_1 = arith.constant 0 : index
    %15 = vector.load %arg3[%14, %c0, %c0_1] : memref<2x384x128xbf16, #tpu.memory_space<vmem>>, vector<1x384x128xbf16>
    %16 = vector.shape_cast %15 : vector<1x384x128xbf16> to vector<384x128xbf16>
    %17 = arith.index_cast %arg1 : i32 to index
    %c0_2 = arith.constant 0 : index
    %c0_3 = arith.constant 0 : index
    %18 = vector.load %arg5[%17, %c0_2, %c0_3] : memref<2x384x128xbf16, #tpu.memory_space<vmem>>, vector<1x384x128xbf16>
    %19 = vector.shape_cast %18 : vector<1x384x128xbf16> to vector<384x128xbf16>
    %20 = arith.index_cast %arg1 : i32 to index
    %c0_4 = arith.constant 0 : index
    %c0_5 = arith.constant 0 : index
    %21 = vector.load %arg4[%20, %c0_4, %c0_5] : memref<2x1x128xf32, #tpu.memory_space<vmem>>, vector<1x1x128xf32>
    %22 = vector.shape_cast %21 : vector<1x1x128xf32> to vector<1x128xf32>
    %23 = arith.index_cast %arg1 : i32 to index
    %c0_6 = arith.constant 0 : index
    %c0_7 = arith.constant 0 : index
    %24 = vector.load %arg6[%23, %c0_6, %c0_7] : memref<2x1x128xf32, #tpu.memory_space<vmem>>, vector<1x1x128xf32>
    %25 = vector.shape_cast %24 : vector<1x1x128xf32> to vector<1x128xf32>
    %26 = vector.shape_cast %22 : vector<1x128xf32> to vector<1x128xf32>
    %27 = vector.broadcast %26 : vector<1x128xf32> to vector<48x128xf32>
    %c7 = arith.constant 7 : index
    %c0_8 = arith.constant 0 : index
    %28 = vector.load %arg8[%c7, %c0_8] : memref<64x128xf32, #tpu.memory_space<vmem>>, vector<48x128xf32>
    %29 = arith.truncf %28 : vector<48x128xf32> to vector<48x128xbf16>
    %30 = vector.extract_strided_slice %16 {offsets = [0, 0], sizes = [128, 128], strides = [1, 1]} : vector<384x128xbf16> to vector<128x128xbf16>
    %cst = arith.constant dense<0.000000e+00> : vector<48x128xf32>
    %31 = tpu.matmul %29, %30, %cst {dimension_numbers = #tpu.dot_dimension_numbers<[1], [0], [0], [1], [0, 0, 1, 1], [], []>} : vector<48x128xbf16>, vector<128x128xbf16>, vector<48x128xf32> -> vector<48x128xf32>
    %32 = arith.addf %27, %31 : vector<48x128xf32>
    %c8 = arith.constant 8 : index
    %c0_9 = arith.constant 0 : index
    %33 = vector.load %arg8[%c8, %c0_9] : memref<64x128xf32, #tpu.memory_space<vmem>>, vector<48x128xf32>
    %34 = arith.truncf %33 : vector<48x128xf32> to vector<48x128xbf16>
    %35 = vector.extract_strided_slice %16 {offsets = [128, 0], sizes = [128, 128], strides = [1, 1]} : vector<384x128xbf16> to vector<128x128xbf16>
    %cst_10 = arith.constant dense<0.000000e+00> : vector<48x128xf32>
    %36 = tpu.matmul %34, %35, %cst_10 {dimension_numbers = #tpu.dot_dimension_numbers<[1], [0], [0], [1], [0, 0, 1, 1], [], []>} : vector<48x128xbf16>, vector<128x128xbf16>, vector<48x128xf32> -> vector<48x128xf32>
    %37 = arith.addf %32, %36 : vector<48x128xf32>
    %c9 = arith.constant 9 : index
    %c0_11 = arith.constant 0 : index
    %38 = vector.load %arg8[%c9, %c0_11] : memref<64x128xf32, #tpu.memory_space<vmem>>, vector<48x128xf32>
    %39 = arith.truncf %38 : vector<48x128xf32> to vector<48x128xbf16>
    %40 = vector.extract_strided_slice %16 {offsets = [256, 0], sizes = [128, 128], strides = [1, 1]} : vector<384x128xbf16> to vector<128x128xbf16>
    %cst_12 = arith.constant dense<0.000000e+00> : vector<48x128xf32>
    %41 = tpu.matmul %39, %40, %cst_12 {dimension_numbers = #tpu.dot_dimension_numbers<[1], [0], [0], [1], [0, 0, 1, 1], [], []>} : vector<48x128xbf16>, vector<128x128xbf16>, vector<48x128xf32> -> vector<48x128xf32>
    %42 = arith.addf %37, %41 : vector<48x128xf32>
    %cst_13 = arith.constant 0.000000e+00 : f32
    %43 = vector.broadcast %cst_13 : f32 to vector<48x128xf32>
    %44 = arith.maximumf %42, %43 : vector<48x128xf32>
    %45 = vector.broadcast %13 : vector<48x1xf32> to vector<48x128xf32>
    %46 = arith.mulf %44, %45 : vector<48x128xf32>
    %c8_14 = arith.constant 8 : index
    %c0_15 = arith.constant 0 : index
    %47 = vector.load %arg9[%c8_14, %c0_15] : memref<64x128xf32, #tpu.memory_space<vmem>>, vector<48x128xf32>
    tpu.vector_store %arg9[%c8_14, %c0_15], %46 {strides = array<i32>} : memref<64x128xf32, #tpu.memory_space<vmem>>, vector<48x128xf32>,
    %48 = vector.shape_cast %25 : vector<1x128xf32> to vector<1x128xf32>
    %49 = vector.broadcast %48 : vector<1x128xf32> to vector<48x128xf32>
    %c7_16 = arith.constant 7 : index
    %c0_17 = arith.constant 0 : index
    %50 = vector.load %arg9[%c7_16, %c0_17] : memref<64x128xf32, #tpu.memory_space<vmem>>, vector<48x128xf32>
    %51 = arith.truncf %50 : vector<48x128xf32> to vector<48x128xbf16>
    %52 = vector.extract_strided_slice %19 {offsets = [0, 0], sizes = [128, 128], strides = [1, 1]} : vector<384x128xbf16> to vector<128x128xbf16>
    %cst_18 = arith.constant dense<0.000000e+00> : vector<48x128xf32>
    %53 = tpu.matmul %51, %52, %cst_18 {dimension_numbers = #tpu.dot_dimension_numbers<[1], [0], [0], [1], [0, 0, 1, 1], [], []>} : vector<48x128xbf16>, vector<128x128xbf16>, vector<48x128xf32> -> vector<48x128xf32>
    %54 = arith.addf %49, %53 : vector<48x128xf32>
    %c8_19 = arith.constant 8 : index
    %c0_20 = arith.constant 0 : index
    %55 = vector.load %arg9[%c8_19, %c0_20] : memref<64x128xf32, #tpu.memory_space<vmem>>, vector<48x128xf32>
    %56 = arith.truncf %55 : vector<48x128xf32> to vector<48x128xbf16>
    %57 = vector.extract_strided_slice %19 {offsets = [128, 0], sizes = [128, 128], strides = [1, 1]} : vector<384x128xbf16> to vector<128x128xbf16>
    %cst_21 = arith.constant dense<0.000000e+00> : vector<48x128xf32>
    %58 = tpu.matmul %56, %57, %cst_21 {dimension_numbers = #tpu.dot_dimension_numbers<[1], [0], [0], [1], [0, 0, 1, 1], [], []>} : vector<48x128xbf16>, vector<128x128xbf16>, vector<48x128xf32> -> vector<48x128xf32>
    %59 = arith.addf %54, %58 : vector<48x128xf32>
    %c9_22 = arith.constant 9 : index
    %c0_23 = arith.constant 0 : index
    %60 = vector.load %arg9[%c9_22, %c0_23] : memref<64x128xf32, #tpu.memory_space<vmem>>, vector<48x128xf32>
    %61 = arith.truncf %60 : vector<48x128xf32> to vector<48x128xbf16>
    %62 = vector.extract_strided_slice %19 {offsets = [256, 0], sizes = [128, 128], strides = [1, 1]} : vector<384x128xbf16> to vector<128x128xbf16>
    %cst_24 = arith.constant dense<0.000000e+00> : vector<48x128xf32>
    %63 = tpu.matmul %61, %62, %cst_24 {dimension_numbers = #tpu.dot_dimension_numbers<[1], [0], [0], [1], [0, 0, 1, 1], [], []>} : vector<48x128xbf16>, vector<128x128xbf16>, vector<48x128xf32> -> vector<48x128xf32>
    %64 = arith.addf %59, %63 : vector<48x128xf32>
    %65 = vector.broadcast %13 : vector<48x1xf32> to vector<48x128xf32>
    %66 = arith.mulf %64, %65 : vector<48x128xf32>
    %c8_25 = arith.constant 8 : index
    %c0_26 = arith.constant 0 : index
    %67 = vector.load %arg8[%c8_25, %c0_26] : memref<64x128xf32, #tpu.memory_space<vmem>>, vector<48x128xf32>
    %68 = arith.addf %67, %66 : vector<48x128xf32>
    %c8_27 = arith.constant 8 : index
    %c0_28 = arith.constant 0 : index
    %69 = vector.load %arg8[%c8_27, %c0_28] : memref<64x128xf32, #tpu.memory_space<vmem>>, vector<48x128xf32>
    tpu.vector_store %arg8[%c8_27, %c0_28], %68 {strides = array<i32>} : memref<64x128xf32, #tpu.memory_space<vmem>>, vector<48x128xf32>,
    %c1_i32 = arith.constant 1 : i32
    %70 = arith.cmpi eq, %arg1, %c1_i32 : i32
    %71 = arith.extui %70 : i1 to i32
    %c0_i32_29 = arith.constant 0 : i32
    %72 = arith.cmpi ne, %71, %c0_i32_29 : i32
    scf.if %72 {
      %c8_30 = arith.constant 8 : index
      %c0_31 = arith.constant 0 : index
      %73 = vector.load %arg8[%c8_30, %c0_31] : memref<64x128xf32, #tpu.memory_space<vmem>>, vector<16x128xf32>
      %c0_32 = arith.constant 0 : index
      %c0_33 = arith.constant 0 : index
      %c0_34 = arith.constant 0 : index
      %74 = vector.load %arg7[%c0_32, %c0_33, %c0_34] : memref<2x16x128xf32, #tpu.memory_space<vmem>>, vector<1x16x128xf32>
      %75 = vector.shape_cast %74 : vector<1x16x128xf32> to vector<16x128xf32>
      %76 = vector.shape_cast %73 : vector<16x128xf32> to vector<1x16x128xf32>
      tpu.vector_store %arg7[%c0_32, %c0_33, %c0_34], %76 {strides = array<i32>} : memref<2x16x128xf32, #tpu.memory_space<vmem>>, vector<1x16x128xf32>,
      %c32 = arith.constant 32 : index
      %c0_35 = arith.constant 0 : index
      %77 = vector.load %arg8[%c32, %c0_35] : memref<64x128xf32, #tpu.memory_space<vmem>>, vector<16x128xf32>
      %c1 = arith.constant 1 : index
      %c0_36 = arith.constant 0 : index
      %c0_37 = arith.constant 0 : index
      %78 = vector.load %arg7[%c1, %c0_36, %c0_37] : memref<2x16x128xf32, #tpu.memory_space<vmem>>, vector<1x16x128xf32>
      %79 = vector.shape_cast %78 : vector<1x16x128xf32> to vector<16x128xf32>
      %80 = vector.shape_cast %77 : vector<16x128xf32> to vector<1x16x128xf32>
      tpu.vector_store %arg7[%c1, %c0_36, %c0_37], %80 {strides = array<i32>} : memref<2x16x128xf32, #tpu.memory_space<vmem>>, vector<1x16x128xf32>,
    } else {
    }
    return
  }
  func.func @transform_0(%arg0: i32, %arg1: i32) -> (i32, i32, i32) {
    %c0_i32 = arith.constant 0 : i32
    %c0_i32_0 = arith.constant 0 : i32
    %c0_i32_1 = arith.constant 0 : i32
    return %arg0, %c0_i32, %c0_i32_0 : i32, i32, i32
  }
  func.func @transform_1(%arg0: i32, %arg1: i32) -> (i32, i32, i32) {
    %c0_i32 = arith.constant 0 : i32
    %c0_i32_0 = arith.constant 0 : i32
    %c0_i32_1 = arith.constant 0 : i32
    %c0_i32_2 = arith.constant 0 : i32
    return %c0_i32, %c0_i32_0, %c0_i32_1 : i32, i32, i32
  }
  func.func @transform_2(%arg0: i32, %arg1: i32) -> (i32, i32, i32) {
    %c0_i32 = arith.constant 0 : i32
    %c0_i32_0 = arith.constant 0 : i32
    %c0_i32_1 = arith.constant 0 : i32
    %c0_i32_2 = arith.constant 0 : i32
    return %c0_i32, %c0_i32_0, %c0_i32_1 : i32, i32, i32
  }
  func.func @transform_3(%arg0: i32, %arg1: i32) -> (i32, i32, i32) {
    %c0_i32 = arith.constant 0 : i32
    %c0_i32_0 = arith.constant 0 : i32
    %c0_i32_1 = arith.constant 0 : i32
    %c0_i32_2 = arith.constant 0 : i32
    return %c0_i32, %c0_i32_0, %c0_i32_1 : i32, i32, i32
  }
  func.func @transform_4(%arg0: i32, %arg1: i32) -> (i32, i32, i32) {
    %c0_i32 = arith.constant 0 : i32
    %c0_i32_0 = arith.constant 0 : i32
    %c0_i32_1 = arith.constant 0 : i32
    %c0_i32_2 = arith.constant 0 : i32
    return %c0_i32, %c0_i32_0, %c0_i32_1 : i32, i32, i32
  }
  func.func @transform_5(%arg0: i32, %arg1: i32) -> (i32, i32, i32) {
    %c0_i32 = arith.constant 0 : i32
    %c0_i32_0 = arith.constant 0 : i32
    %c0_i32_1 = arith.constant 0 : i32
    return %arg0, %c0_i32, %c0_i32_0 : i32, i32, i32
  }
}

</mosaic_0001>

<bundles_post_ra>
// kernel: res_group_in.1
= control target key start
LH: loop header
LB: loop body
LE: loop exit
PB: predicated region body
PF: predicated region fallthrough
CT: control target
= control target key end

     0   :  { %s1430_s18 = smov 0   ;;  %s1432_s19 = smov 0   ;;  %s1590_s0 = inlined_call_operand.vmem [shape: f32[2,16,128], index: 0, kind: input, shape index: {}]   ;;  %s1591_s1 = inlined_call_operand.vmem [shape: bf16[2,384,128], index: 1, kind: input, shape index: {}]   ;;  %s1592_s2 = inlined_call_operand.vmem [shape: f32[2,1,128], index: 2, kind: input, shape index: {}]   ;;  %s1593_s3 = inlined_call_operand.vmem [shape: bf16[2,384,128], index: 3, kind: input, shape index: {}]   ;;  %s1594_s4 = inlined_call_operand.vmem [shape: f32[2,1,128], index: 4, kind: input, shape index: {}]   ;;  %s1595_s5 = inlined_call_operand.vmem [shape: f32[2,16,128], index: 5, kind: output, shape index: {}]  }
   0x1   :  { %s1434_s20 = smov 0  }
   0x2 LB: > { %s24_s21 = sadd.s32 1, %s1393_s19  ;;  %p1077_p0 = scmp.ge.s32.totalorder %s1397_s20, 1  ;;  %s1397_s20 = sphi %s1434_s20, %s15_s20   ;;  %s1393_s19 = sphi %s1432_s19, %s1597_s19   ;;  %s1389_s18 = sphi %s1430_s18, %s1596_s18  }
   0x3   : > { %p25_p1 = scmp.ge.s32.totalorder %s24_s21, 2  ;;  %p201_p2 = scmp.lt.s32.totalorder %s1397_s20, 3 }
   0x5   : > { %s1599_s21 = smov (%p25_p1, %s24_s21), 0  ;;  %p202_p3 = pnand %p1077_p0, %p201_p2 }
   0x6   : > { %p1078_p4 = scmp.ne.s32.totalorder (!%p202_p3), %s1389_s18, 0 }
   0x7   : > { %205 = sbr.rel (%p202_p3) target bundleno = 439 (0x1b7), region = 40 }
   0xc   : > { %248 = sbr.rel (%p1078_p4) target bundleno = 28 (0x1c), region = 44 }
  0x11   : > { %v1399_v0 = vmov 0.0   ;;  %v253_v1 = vld [vmem:[%s1590_s0] sm:$0xff]  ;;  %v254_v2 = vld [vmem:[%s1590_s0 + $0x8] sm:$0xff]  ;;  %v1079_v3 = vld [vmem:[%s1590_s0 + $0x10] sm:$0xff] }
  0x12   : > { %249 = vst [vmem:[#allocation2] sm:$0xff] %v1399_v0  ;;  %v1080_v4 = vld [vmem:[%s1590_s0 + $0x18] sm:$0xff] }
  0x13   : > { %250 = vst [vmem:[#allocation3] sm:$0xff] %v1399_v0 }
  0x14   : > { %251 = vst [vmem:[#allocation2 + $0x38] sm:$0xff] %v1399_v0 }
  0x15   : > { %252 = vst [vmem:[#allocation3 + $0x38] sm:$0xff] %v1399_v0 }
  0x16   : > { %257 = vst [vmem:[#allocation2 + $0x18] sm:$0xff] %v1399_v0 }
  0x17   : > { %263 = vst [vmem:[#allocation2 + $0x30] sm:$0xff] %v1399_v0 }
  0x18   : > { %255 = vst [vmem:[#allocation2 + $0x8] sm:$0xff] %v253_v1 }
  0x19   : > { %256 = vst [vmem:[#allocation2 + $0x10] sm:$0xff] %v254_v2 }
  0x1a   : > { %261 = vst [vmem:[#allocation2 + $0x20] sm:$0xff] %v1079_v3 }
  0x1b   : > { %262 = vst [vmem:[#allocation2 + $0x28] sm:$0xff] %v1080_v4 }
  0x1c PF: > { %s1282_s30 = smul.u32 192, %s1389_s18  ;;  %s414_s8 = scalar_lea.vmem %s1592_s2, %s1389_s18 }
  0x1d   : > { %v1508_v40 = vld [vmem:[#allocation2 + $0x18] sm:$0xff]  ;;  %s416_s23 = scalar_lea.vmem %s1594_s4, %s1389_s18  ;;  %p1275_p5 = scmp.ne.s32.totalorder %s1389_s18, 1 }
  0x1e   : > { %s1473_s11 = scalar_lea.vmem %s1591_s1, %s1282_s30  ;;  %v1493_v24 = vld [vmem:[#allocation2 + $0x30] sm:$0xff]  ;;  %s1522_s14 = scalar_lea.vmem %s1593_s3, %s1282_s30 }
  0x1f   : > { %v1290_v5 = vld [vmem:[%s1473_s11 + $0x38] sm:$0xff]  ;;  %v1289_v7 = vld [vmem:[%s1473_s11 + $0x30] sm:$0xff]  ;;  %v1288_v9 = vld [vmem:[%s1473_s11 + $0x28] sm:$0xff] }
  0x20   : > { %v1298_v6 = vld [vmem:[%s1473_s11 + $0x78] sm:$0xff]  ;;  %1332 = vmatpush.bf16.msra.mxu2 %v1290_v5  ;;  %v1297_v8 = vld [vmem:[%s1473_s11 + $0x70] sm:$0xff]  ;;  %478 = vmatpush.bf16.msra.mxu0 %v1290_v5  ;;  %v1296_v10 = vld [vmem:[%s1473_s11 + $0x68] sm:$0xff] }
  0x21   : > { %1340 = vmatpush.bf16.msra.mxu3 %v1298_v6  ;;  %565 = vmatpush.bf16.msra.mxu1 %v1298_v6  ;;  %v1287_v11 = vld [vmem:[%s1473_s11 + $0x20] sm:$0xff]  ;;  %v1286_v13 = vld [vmem:[%s1473_s11 + $0x18] sm:$0xff]  ;;  %v1285_v15 = vld [vmem:[%s1473_s11 + $0x10] sm:$0xff] }
  0x22   : > { %v1295_v12 = vld [vmem:[%s1473_s11 + $0x60] sm:$0xff]  ;;  %v1294_v14 = vld [vmem:[%s1473_s11 + $0x58] sm:$0xff]  ;;  %v1293_v16 = vld [vmem:[%s1473_s11 + $0x50] sm:$0xff] }
  0x23   : > { %v1284_v17 = vld [vmem:[%s1473_s11 + $0x8] sm:$0xff]  ;;  %v1283_v19 = vld [vmem:[%s1473_s11] sm:$0xff]  ;;  %v1306_v25 = vld [vmem:[%s1473_s11 + $0xb8] sm:$0xff] }
  0x24   : > { %1333 = vmatpush.bf16.msra.mxu2 %v1289_v7  ;;  %479 = vmatpush.bf16.msra.mxu0 %v1289_v7  ;;  %v1292_v18 = vld [vmem:[%s1473_s11 + $0x48] sm:$0xff]  ;;  %v1291_v20 = vld [vmem:[%s1473_s11 + $0x40] sm:$0xff]  ;;  %v1498_v29 = vld [vmem:[#allocation2 + $0x10] sm:$0xff] }
  0x25   : > { %1341 = vmatpush.bf16.msra.mxu3 %v1297_v8  ;;  %566 = vmatpush.bf16.msra.mxu1 %v1297_v8  ;;  %v425_v21 = vld [vmem:[#allocation2 + $0x27] sm:$0xff]  ;;  %v426_v22 = vld [vmem:[#allocation2 + $0x2f] sm:$0xff]  ;;  %v1302_v37 = vld [vmem:[%s1473_s11 + $0x98] sm:$0xff] }
  0x26   : > { %v1491_v23 = vld [vmem:[#allocation2 + $0x28] sm:$0xff]  ;;  %v429_v30 = vpack.c.bf16 %v426_v22, %v425_v21  ;;  %v1305_v33 = vld [vmem:[%s1473_s11 + $0xb0] sm:$0xff]  ;;  %v1303_v36 = vld [vmem:[%s1473_s11 + $0xa0] sm:$0xff] }
  0x27   : > { %v421_v26 = vld [vmem:[#allocation2 + $0x7] sm:$0xff]  ;;  %v422_v27 = vld [vmem:[#allocation2 + $0xf] sm:$0xff]  ;;  %v516_v31 = vpack.c.bf16 %v1493_v24, %v1491_v23  ;;  %v423_v38 = vld [vmem:[#allocation2 + $0x17] sm:$0xff] }
  0x28   : > { %1334 = vmatpush.bf16.msra.mxu2 %v1288_v9  ;;  %480 = vmatpush.bf16.msra.mxu0 %v1288_v9  ;;  %v1496_v28 = vld [vmem:[#allocation2 + $0x8] sm:$0xff]  ;;  %v427_v32 = vpack.c.bf16 %v422_v27, %v421_v26  ;;  %v424_v39 = vld [vmem:[#allocation2 + $0x1f] sm:$0xff]  ;;  %v1301_v43 = vld [vmem:[%s1473_s11 + $0x90] sm:$0xff] }
  0x29   : > { %1342 = vmatpush.bf16.msra.mxu3 %v1296_v10  ;;  %567 = vmatpush.bf16.msra.mxu1 %v1296_v10  ;;  %v514_v34 = vpack.c.bf16 %v1498_v29, %v1496_v28  ;;  %v1304_v35 = vld [vmem:[%s1473_s11 + $0xa8] sm:$0xff]  ;;  %v1510_v41 = vld [vmem:[#allocation2 + $0x20] sm:$0xff]  ;;  %v428_v42 = vpack.c.bf16 %v424_v39, %v423_v38  ;;  %v596_v48 = vld [vmem:[#allocation2 + $0x11] sm:$0xff] }
  0x2a   : > { %v515_v44 = vpack.c.bf16 %v1510_v41, %v1508_v40  ;;  %v1300_v45 = vld [vmem:[%s1473_s11 + $0x88] sm:$0xff]  ;;  %v1299_v46 = vld [vmem:[%s1473_s11 + $0x80] sm:$0xff]  ;;  %v600_v54 = vld [vmem:[#allocation2 + $0x31] sm:$0xff] }
  0x2b   : > { %v595_v47 = vld [vmem:[#allocation2 + $0x9] sm:$0xff]  ;;  %v597_v50 = vld [vmem:[#allocation2 + $0x19] sm:$0xff]  ;;  %v598_v51 = vld [vmem:[#allocation2 + $0x21] sm:$0xff] }
  0x2c   : > { %1335 = vmatpush.bf16.msra.mxu2 %v1287_v11  ;;  %481 = vmatpush.bf16.msra.mxu0 %v1287_v11  ;;  %v601_v49 = vpack.c.bf16 %v596_v48, %v595_v47  ;;  %v602_v52 = vpack.c.bf16 %v598_v51, %v597_v50  ;;  %v599_v53 = vld [vmem:[#allocation2 + $0x29] sm:$0xff]  ;;  %v1315_v56 = vld [vmem:[%s1522_s14 + $0x38] sm:$0xff]  ;;  %v1320_v61 = vld [vmem:[%s1522_s14 + $0x60] sm:$0xff] }
  0x2d   : > { %1343 = vmatpush.bf16.msra.mxu3 %v1295_v12  ;;  %568 = vmatpush.bf16.msra.mxu1 %v1295_v12  ;;  %v603_v55 = vpack.c.bf16 %v600_v54, %v599_v53  ;;  %v1323_v57 = vld [vmem:[%s1522_s14 + $0x78] sm:$0xff]  ;;  %v1314_v58 = vld [vmem:[%s1522_s14 + $0x30] sm:$0xff]  ;;  %v1321_v60 = vld [vmem:[%s1522_s14 + $0x68] sm:$0xff] }
  0x2e   : > { %v1322_v59 = vld [vmem:[%s1522_s14 + $0x70] sm:$0xff]  ;;  %v1313_v62 = vld [vmem:[%s1522_s14 + $0x28] sm:$0xff]  ;;  %v1319_v63 = vld [vmem:[%s1522_s14 + $0x58] sm:$0xff] }
  0x2f   : > { %v1331_v0 = vld [vmem:[%s1522_s14 + $0xb8] sm:$0xff]  ;;  %v1312_v1 = vld [vmem:[%s1522_s14 + $0x20] sm:$0xff]  ;;  %v1318_v2 = vld [vmem:[%s1522_s14 + $0x50] sm:$0xff] }
  0x30   : > { %1336 = vmatpush.bf16.msra.mxu2 %v1286_v13  ;;  %482 = vmatpush.bf16.msra.mxu0 %v1286_v13  ;;  %v1330_v3 = vld [vmem:[%s1522_s14 + $0xb0] sm:$0xff]  ;;  %v1311_v4 = vld [vmem:[%s1522_s14 + $0x18] sm:$0xff]  ;;  %v1317_v5 = vld [vmem:[%s1522_s14 + $0x48] sm:$0xff] }
  0x31   : > { %1344 = vmatpush.bf16.msra.mxu3 %v1294_v14  ;;  %569 = vmatpush.bf16.msra.mxu1 %v1294_v14  ;;  %v1329_v6 = vld [vmem:[%s1522_s14 + $0xa8] sm:$0xff]  ;;  %v1310_v7 = vld [vmem:[%s1522_s14 + $0x10] sm:$0xff]  ;;  %v1316_v8 = vld [vmem:[%s1522_s14 + $0x40] sm:$0xff] }
  0x32   : > { %v1328_v9 = vld [vmem:[%s1522_s14 + $0xa0] sm:$0xff]  ;;  %v1309_v11 = vld [vmem:[%s1522_s14 + $0x8] sm:$0xff]  ;;  %v1327_v12 = vld [vmem:[%s1522_s14 + $0x98] sm:$0xff] }
  0x33   : > { %v1308_v14 = vld [vmem:[%s1522_s14] sm:$0xff] }
  0x34   : > { %1337 = vmatpush.bf16.msra.mxu2 %v1285_v15  ;;  %483 = vmatpush.bf16.msra.mxu0 %v1285_v15  ;;  %v1326_v15 = vld [vmem:[%s1522_s14 + $0x90] sm:$0xff]  ;;  %v1324_v22 = vld [vmem:[%s1522_s14 + $0x80] sm:$0xff] }
  0x35   : > { %1345 = vmatpush.bf16.msra.mxu3 %v1293_v16  ;;  %570 = vmatpush.bf16.msra.mxu1 %v1293_v16 }
  0x38   : > { %1338 = vmatpush.bf16.msra.mxu2 %v1284_v17  ;;  %484 = vmatpush.bf16.msra.mxu0 %v1284_v17  ;;  %v1373_v17 = vld [vmem:[%s414_s8] ss:$0 sm:$0xff] }
  0x39   : > { %1346 = vmatpush.bf16.msra.mxu3 %v1292_v18  ;;  %571 = vmatpush.bf16.msra.mxu1 %v1292_v18 }
  0x3c   : > { %1339 = vmatpush.bf16.msra.mxu2 %v1283_v19  ;;  %485 = vmatpush.bf16.msra.mxu0 %v1283_v19  ;;  %v1325_v19 = vld [vmem:[%s1522_s14 + $0x88] sm:$0xff] }
  0x3d   : > { %1347 = vmatpush.bf16.msra.mxu3 %v1291_v20  ;;  %572 = vmatpush.bf16.msra.mxu1 %v1291_v20 }
  0x3f   : > { %496 = vmatmul.bf16.vlgmr.msra.gmra.mxu2 %v429_v30  ;;  %486 = vmatmul.bf16.vlgmr.msra.gmra.mxu0 %v427_v32 }
  0x40   : > { %652 = vmatpush.bf16.msrb.mxu2 %v1306_v25  ;;  %583 = vmatmul.bf16.vlgmr.msra.gmra.mxu3 %v516_v31 }
  0x41   : > { %573 = vmatmul.bf16.vlgmr.msra.gmra.mxu1 %v514_v34  ;;  %760 = vmatpush.bf16.msrb.mxu3 %v1315_v56 }
  0x42   : > { %847 = vmatpush.bf16.msrb.mxu0 %v1323_v57  ;;  %934 = vmatpush.bf16.msrb.mxu1 %v1331_v0 }
  0x44   : > { %653 = vmatpush.bf16.msrb.mxu2 %v1305_v33 }
  0x45   : > { %761 = vmatpush.bf16.msrb.mxu3 %v1314_v58 }
  0x46   : > { %848 = vmatpush.bf16.msrb.mxu0 %v1322_v59  ;;  %935 = vmatpush.bf16.msrb.mxu1 %v1330_v3 }
  0x48   : > { %654 = vmatpush.bf16.msrb.mxu2 %v1304_v35 }
  0x49   : > { %762 = vmatpush.bf16.msrb.mxu3 %v1313_v62 }
  0x4a   : > { %849 = vmatpush.bf16.msrb.mxu0 %v1321_v60  ;;  %936 = vmatpush.bf16.msrb.mxu1 %v1329_v6 }
  0x4c   : > { %655 = vmatpush.bf16.msrb.mxu2 %v1303_v36 }
  0x4d   : > { %763 = vmatpush.bf16.msrb.mxu3 %v1312_v1 }
  0x4e   : > { %850 = vmatpush.bf16.msrb.mxu0 %v1320_v61  ;;  %937 = vmatpush.bf16.msrb.mxu1 %v1328_v9 }
  0x4f   : > { %491 = vmatmul.bf16.gmra.mxu0 %v428_v42 }
  0x50   : > { %656 = vmatpush.bf16.msrb.mxu2 %v1302_v37 }
  0x51   : > { %578 = vmatmul.bf16.gmra.mxu1 %v515_v44  ;;  %764 = vmatpush.bf16.msrb.mxu3 %v1311_v4 }
  0x52   : > { %851 = vmatpush.bf16.msrb.mxu0 %v1319_v63  ;;  %938 = vmatpush.bf16.msrb.mxu1 %v1327_v12 }
  0x54   : > { %657 = vmatpush.bf16.msrb.mxu2 %v1301_v43 }
  0x55   : > { %765 = vmatpush.bf16.msrb.mxu3 %v1310_v7 }
  0x56   : > { %852 = vmatpush.bf16.msrb.mxu0 %v1318_v2  ;;  %939 = vmatpush.bf16.msrb.mxu1 %v1326_v15 }
  0x58   : > { %658 = vmatpush.bf16.msrb.mxu2 %v1300_v45 }
  0x59   : > { %766 = vmatpush.bf16.msrb.mxu3 %v1309_v11 }
  0x5a   : > { %853 = vmatpush.bf16.msrb.mxu0 %v1317_v5  ;;  %940 = vmatpush.bf16.msrb.mxu1 %v1325_v19 }
  0x5c   : > { %659 = vmatpush.bf16.msrb.mxu2 %v1299_v46 }
  0x5d   : > { %767 = vmatpush.bf16.msrb.mxu3 %v1308_v14 }
  0x5e   : > { %854 = vmatpush.bf16.msrb.mxu0 %v1316_v8  ;;  %941 = vmatpush.bf16.msrb.mxu1 %v1324_v22 }
  0x5f   : > { %660 = vmatmul.bf16.vlgmr.msrb.gmra.mxu2 %v601_v49 }
  0x6f   : > { %665 = vmatmul.bf16.gmra.mxu2 %v602_v52 }
  0x7f   : > { %670 = vmatmul.bf16.gmra.mxu2 %v603_v55 }
  0xbc   : > { %v487_v13 = vpop.f32.mrf.mxu0 }
  0xbd   : > { %v502_v20 = vadd.f32 %v1373_v17, %v487_v13 }
  0xbe   : > { %v574_v16 = vpop.f32.mrf.mxu1 }
  0xbf   : > { %v589_v25 = vadd.f32 %v574_v16, %v502_v20 }
  0xc2   : > { %v497_v10 = vpop.f32.mrf.mxu2 }
  0xc3   : > { %v584_v57 = vpop.f32.mrf.mxu3  ;;  %v506_v58 = vadd.f32 %v1373_v17, %v497_v10 }
  0xc4   : > { %v489_v21 = vpop.f32.mrf.mxu0 }
  0xc5   : > { %v503_v31 = vadd.f32 %v1373_v17, %v489_v21  ;;  %v593_v63 = vadd.f32 %v584_v57, %v506_v58 }
  0xc6   : > { %v576_v26 = vpop.f32.mrf.mxu1 }
  0xc7   : > { %v590_v34 = vadd.f32 %v576_v26, %v503_v31 }
  0xca   : > { %v499_v18 = vpop.f32.mrf.mxu2 }
  0xcb   : > { %v507_v3 = vadd.f32 %v1373_v17, %v499_v18  ;;  %v586_v5 = vpop.f32.mrf.mxu3 }
  0xcc   : > { %v492_v33 = vpop.f32.mrf.mxu0 }
  0xcd   : > { %v504_v36 = vadd.f32 %v1373_v17, %v492_v33  ;;  %v594_v9 = vadd.f32 %v586_v5, %v507_v3 }
  0xce   : > { %v579_v38 = vpop.f32.mrf.mxu1 }
  0xcf   : > { %v591_v42 = vadd.f32 %v579_v38, %v504_v36 }
  0xd4   : > { %v494_v44 = vpop.f32.mrf.mxu0 }
  0xd5   : > { %v505_v47 = vadd.f32 %v1373_v17, %v494_v44 }
  0xd6   : > { %v581_v49 = vpop.f32.mrf.mxu1 }
  0xd7   : > { %v592_v54 = vadd.f32 %v581_v49, %v505_v47 }
  0xe2   : > { %v661_v27 = vpop.f32.mrf.mxu2 }
  0xe3   : > { %v676_v30 = vadd.f32 %v661_v27, %v589_v25  ;;  %v1374_v27 = vld [vmem:[%s416_s23] ss:$0 sm:$0xff] }
  0xe5   : > { %v682_v32 = vmax.f32 %v676_v30, 0.0 }
  0xe7   : > { %694 = vst [vmem:[#allocation3 + $0x8] sm:$0xff] %v682_v32 }
  0xea   : > { %v663_v35 = vpop.f32.mrf.mxu2 }
  0xeb   : > { %v677_v37 = vadd.f32 %v663_v35, %v590_v34 }
  0xed   : > { %v683_v39 = vmax.f32 %v677_v37, 0.0 }
  0xee   : > { %v703_v50 = vld [vmem:[#allocation3 + $0x7] sm:$0xff] }
  0xef   : > { %695 = vst [vmem:[#allocation3 + $0x10] sm:$0xff] %v683_v39  ;;  %v796_v43 = vpack.c.bf16 %v683_v39, %v682_v32 }
  0xf1   : > { %855 = vmatmul.bf16.vlgmr.msrb.gmra.mxu0 %v796_v43 }
  0xf2   : > { %v666_v45 = vpop.f32.mrf.mxu2 }
  0xf3   : > { %v678_v46 = vadd.f32 %v666_v45, %v591_v42 }
  0xf5   : > { %v684_v48 = vmax.f32 %v678_v46, 0.0 }
  0xf6   : > { %v704_v51 = vld [vmem:[#allocation3 + $0xf] sm:$0xff] }
  0xf7   : > { %v690_v52 = vmul.f32 0.0, %v684_v48  ;;  %v709_v53 = vpack.c.bf16 %v704_v51, %v703_v50  ;;  %v877_v61 = vld [vmem:[#allocation3 + $0x9] sm:$0xff] }
  0xf9   : > { %696 = vst [vmem:[#allocation3 + $0x18] sm:$0xff] %v690_v52  ;;  %768 = vmatmul.bf16.vlgmr.msrb.gmra.mxu3 %v709_v53 }
  0xfa   : > { %v668_v55 = vpop.f32.mrf.mxu2 }
  0xfb   : > { %v679_v56 = vadd.f32 %v668_v55, %v592_v54 }
  0xfd   : > { %v685_v59 = vmax.f32 %v679_v56, 0.0 }
  0xff   : > { %697 = vst [vmem:[#allocation3 + $0x20] sm:$0xff] %v685_v59  ;;  %v797_v60 = vpack.c.bf16 %v685_v59, %v690_v52 }
 0x100   : > { %v878_v62 = vld [vmem:[#allocation3 + $0x11] sm:$0xff] }
 0x101   : > { %v883_v0 = vpack.c.bf16 %v878_v62, %v877_v61  ;;  %860 = vmatmul.bf16.gmra.mxu0 %v797_v60  ;;  %v705_v6 = vld [vmem:[#allocation3 + $0x17] sm:$0xff] }
 0x102   : > { %v671_v1 = vpop.f32.mrf.mxu2 }
 0x103   : > { %v680_v2 = vadd.f32 %v671_v1, %v593_v63  ;;  %942 = vmatmul.bf16.vlgmr.msrb.gmra.mxu1 %v883_v0 }
 0x105   : > { %v686_v4 = vmax.f32 %v680_v2, 0.0 }
 0x106   : > { %v706_v7 = vld [vmem:[#allocation3 + $0x1f] sm:$0xff] }
 0x107   : > { %698 = vst [vmem:[#allocation3 + $0x28] sm:$0xff] %v686_v4  ;;  %v710_v8 = vpack.c.bf16 %v706_v7, %v705_v6  ;;  %v879_v15 = vld [vmem:[#allocation3 + $0x19] sm:$0xff] }
 0x109   : > { %773 = vmatmul.bf16.gmra.mxu3 %v710_v8 }
 0x10a   : > { %v673_v10 = vpop.f32.mrf.mxu2 }
 0x10b   : > { %v681_v11 = vadd.f32 %v673_v10, %v594_v9 }
 0x10d   : > { %v687_v12 = vmax.f32 %v681_v11, 0.0 }
 0x10e   : > { %v880_v13 = vld [vmem:[#allocation3 + $0x21] sm:$0xff] }
 0x10f   : > { %v693_v14 = vmul.f32 0.0, %v687_v12  ;;  %v884_v16 = vpack.c.bf16 %v880_v13, %v879_v15  ;;  %v707_v17 = vld [vmem:[#allocation3 + $0x27] sm:$0xff] }
 0x111   : > { %699 = vst [vmem:[#allocation3 + $0x30] sm:$0xff] %v693_v14  ;;  %v798_v19 = vpack.c.bf16 %v693_v14, %v686_v4 }
 0x113   : > { %947 = vmatmul.bf16.gmra.mxu1 %v884_v16  ;;  %865 = vmatmul.bf16.gmra.mxu0 %v798_v19 }
 0x118   : > { %v708_v18 = vld [vmem:[#allocation3 + $0x2f] sm:$0xff] }
 0x119   : > { %v711_v20 = vpack.c.bf16 %v708_v18, %v707_v17  ;;  %v881_v21 = vld [vmem:[#allocation3 + $0x29] sm:$0xff]  ;;  %v882_v22 = vld [vmem:[#allocation3 + $0x31] sm:$0xff] }
 0x11a   : > { %v885_v25 = vpack.c.bf16 %v882_v22, %v881_v21 }
 0x11b   : > { %778 = vmatmul.bf16.gmra.mxu3 %v711_v20 }
 0x123   : > { %952 = vmatmul.bf16.gmra.mxu1 %v885_v25 }
 0x16e   : > { %v856_v26 = vpop.f32.mrf.mxu0 }
 0x176   : > { %v858_v35 = vpop.f32.mrf.mxu0 }
 0x17c   : > { %v769_v30 = vpop.f32.mrf.mxu3 }
 0x17d   : > { %v784_v31 = vadd.f32 %v1374_v27, %v769_v30 }
 0x17e   : > { %v861_v45 = vpop.f32.mrf.mxu0 }
 0x17f   : > { %v871_v32 = vadd.f32 %v856_v26, %v784_v31 }
 0x180   : > { %v943_v33 = vpop.f32.mrf.mxu1 }
 0x181   : > { %v958_v34 = vadd.f32 %v943_v33, %v871_v32 }
 0x183   : > { %v976_v36 = vadd.f32 %v958_v34, %v1496_v28 }
 0x184   : > { %v771_v37 = vpop.f32.mrf.mxu3 }
 0x185   : > { %982 = vst [vmem:[#allocation2 + $0x8] sm:$0xff] %v976_v36  ;;  %v785_v38 = vadd.f32 %v1374_v27, %v771_v37 }
 0x186   : > { %v863_v54 = vpop.f32.mrf.mxu0 }
 0x187   : > { %v872_v39 = vadd.f32 %v858_v35, %v785_v38 }
 0x188   : > { %v945_v42 = vpop.f32.mrf.mxu1 }
 0x189   : > { %v959_v43 = vadd.f32 %v945_v42, %v872_v39 }
 0x18b   : > { %v977_v44 = vadd.f32 %v959_v43, %v1498_v29 }
 0x18c   : > { %v774_v46 = vpop.f32.mrf.mxu3 }
 0x18d   : > { %983 = vst [vmem:[#allocation2 + $0x10] sm:$0xff] %v977_v44  ;;  %v786_v47 = vadd.f32 %v1374_v27, %v774_v46 }
 0x18f   : > { %v873_v48 = vadd.f32 %v861_v45, %v786_v47 }
 0x190   : > { %v948_v49 = vpop.f32.mrf.mxu1  ;;  %v866_v29 = vpop.f32.mrf.mxu0 }
 0x191   : > { %v960_v50 = vadd.f32 %v948_v49, %v873_v48 }
 0x193   : > { %v966_v51 = vmul.f32 0.0, %v960_v50 }
 0x194   : > { %v776_v52 = vpop.f32.mrf.mxu3 }
 0x195   : > { %v978_v53 = vadd.f32 %v966_v51, %v1508_v40  ;;  %v787_v28 = vadd.f32 %v1374_v27, %v776_v52 }
 0x197   : > { %984 = vst [vmem:[#allocation2 + $0x18] sm:$0xff] %v978_v53  ;;  %v874_v55 = vadd.f32 %v863_v54, %v787_v28 }
 0x198   : > { %v950_v56 = vpop.f32.mrf.mxu1  ;;  %v868_v2 = vpop.f32.mrf.mxu0 }
 0x199   : > { %v961_v57 = vadd.f32 %v950_v56, %v874_v55 }
 0x19b   : > { %v979_v58 = vadd.f32 %v961_v57, %v1510_v41 }
 0x19d   : > { %985 = vst [vmem:[#allocation2 + $0x20] sm:$0xff] %v979_v58 }
 0x19e   : > { %v779_v59 = vpop.f32.mrf.mxu3 }
 0x19f   : > { %v788_v60 = vadd.f32 %v1374_v27, %v779_v59 }
 0x1a0   : > { %v953_v61 = vpop.f32.mrf.mxu1 }
 0x1a1   : > { %v875_v62 = vadd.f32 %v866_v29, %v788_v60 }
 0x1a3   : > { %v962_v63 = vadd.f32 %v953_v61, %v875_v62 }
 0x1a5   : > { %v980_v0 = vadd.f32 %v962_v63, %v1491_v23 }
 0x1a6   : > { %v781_v1 = vpop.f32.mrf.mxu3 }
 0x1a7   : > { %986 = vst [vmem:[#allocation2 + $0x28] sm:$0xff] %v980_v0  ;;  %v789_v40 = vadd.f32 %v1374_v27, %v781_v1 }
 0x1a8   : > { %v955_v4 = vpop.f32.mrf.mxu1 }
 0x1a9   : > { %v876_v3 = vadd.f32 %v868_v2, %v789_v40 }
 0x1ab   : > { %v963_v5 = vadd.f32 %v955_v4, %v876_v3 }
 0x1ad   : > { %v969_v6 = vmul.f32 0.0, %v963_v5  ;;  %991 = sbr.rel (%p1275_p5) target bundleno = 439 (0x1b7), region = 48 }
 0x1af   : > { %v981_v7 = vadd.f32 %v969_v6, %v1493_v24 }
 0x1b1   : > { %987 = vst [vmem:[#allocation2 + $0x30] sm:$0xff] %v981_v7 }
 0x1b2   : > { %v992_v41 = vld [vmem:[#allocation2 + $0x8] sm:$0xff]  ;;  %v993_v8 = vld [vmem:[#allocation2 + $0x10] sm:$0xff]  ;;  %v996_v9 = vld [vmem:[#allocation2 + $0x20] sm:$0xff] }
 0x1b3   : > { %994 = vst [vmem:[%s1595_s5] sm:$0xff] %v992_v41  ;;  %v997_v23 = vld [vmem:[#allocation2 + $0x28] sm:$0xff] }
 0x1b4   : > { %995 = vst [vmem:[%s1595_s5 + $0x8] sm:$0xff] %v993_v8 }
 0x1b5   : > { %1276 = vst [vmem:[%s1595_s5 + $0x10] sm:$0xff] %v996_v9 }
 0x1b6   : > { %1277 = vst [vmem:[%s1595_s5 + $0x18] sm:$0xff] %v997_v23 }
 0x1b7 PF: > { %s15_s20 = sadd.s32 1, %s1397_s20   ;;  %s1596_s18 = smov %s1393_s19 }
 0x1b8   : > { %p12_p6 = scmp.ge.s32.totalorder %s15_s20, 4   ;;  %s1597_s19 = smov %s1599_s21 }
 0x1ba   :  { %14 = sbr.rel (!%p12_p6) target bundleno = 2 (0x2), region = 84 }

</bundles_post_ra>
